<compile_context>
chip_gen: v7x
topology: tpu7x:2x2x1
jax: 0.10.0
libtpu: 0.0.40
codegen_flags: <defaults>
</compile_context>

<pallas_src>
import functools

import jax
import jax.numpy as jnp
from jax.experimental import pallas as pl
from jax.experimental.pallas import tpu as pltpu


def _focal_loss_kernel(logits_ref, targets_ref, alpha_ref, out_ref, *,
                       gamma: float, n_total: int, block_cols: int):
    x = logits_ref[...]      # (C, TN) f32 logits, samples on the lane axis
    t = targets_ref[...]     # (1, TN) i32 target class per sample
    a = alpha_ref[...]       # (C, 1)  f32 per-class alpha weights

    # log-softmax over the class (sublane) axis, numerically stable.
    m = jnp.max(x, axis=0, keepdims=True)                        # (1, TN)
    xm = x - m
    lse = jnp.log(jnp.sum(jnp.exp(xm), axis=0, keepdims=True))   # (1, TN)

    # One-hot of the target via iota compare (equivalent of scatter_(1, ids, 1)).
    row = jax.lax.broadcasted_iota(jnp.int32, x.shape, 0)        # class id / row
    class_mask = (row == t).astype(x.dtype)                      # (C, TN)

    x_t = jnp.sum(xm * class_mask, axis=0, keepdims=True)        # x[target] - m
    log_p = x_t - lse                                            # (1, TN)
    probs = jnp.exp(log_p)                                       # (1, TN)
    alpha_i = jnp.sum(a * class_mask, axis=0, keepdims=True)     # alpha[target]

    one_minus_p = 1.0 - probs
    if gamma == 2.0:
        focal = one_minus_p * one_minus_p      # plain VPU multiply, no EUP pow
    elif gamma == 1.0:
        focal = one_minus_p
    elif gamma == 0.0:
        focal = jnp.ones_like(one_minus_p)
    else:
        focal = jnp.exp(gamma * jnp.log1p(-probs))

    per_sample = -alpha_i * focal * log_p                        # (1, TN)

    # Mask padded / remainder samples (last block) out of the reduction.
    i = pl.program_id(0)
    col = jax.lax.broadcasted_iota(jnp.int32, per_sample.shape, 1) + i * block_cols
    valid = (col < n_total).astype(per_sample.dtype)
    block_sum = jnp.sum(per_sample * valid)                      # scalar

    # Lane-dense partial-sum output: one full (8, 128) tile per grid step.
    out_ref[...] = jnp.broadcast_to(block_sum, out_ref.shape).astype(out_ref.dtype)


def _pick_block_cols(n: int, c: int) -> int:
    """Lane-multiple sample-axis tile; ~4 MiB per logits buffer keeps the
    double-buffered working set far below v7x's 64 MiB VMEM."""
    budget = (4 * 1024 * 1024) // (4 * max(c, 1))
    budget = max(128, (budget // 128) * 128)
    n_cols = max(128, ((n + 127) // 128) * 128)
    return int(min(4096, budget, n_cols))


def focal_loss(logits, targets, alpha=None, gamma=2.0, size_average=True,
               block_cols=None):
    """Pallas TPU implementation of FocalLoss.forward.

    logits:  (N, C) float32
    targets: (N,)   int32
    alpha:   optional (C,) / (C, 1) float32; defaults to ones (as in __init__)
    returns: scalar float32 loss
    """
    N, C = logits.shape
    if alpha is None:
        alpha = jnp.ones((C,), dtype=jnp.float32)
    alpha = jnp.asarray(alpha, dtype=jnp.float32).reshape(C, 1)      # (C, 1)

    tn = int(block_cols) if block_cols is not None else _pick_block_cols(N, C)
    nb = (N + tn - 1) // tn
    n_pad = nb * tn

    # Lane-dense layout: samples on the last (lane) axis; pad remainder with
    # benign zeros (masked out of the reduction in-kernel).
    x_t = jnp.transpose(logits.astype(jnp.float32))                  # (C, N)
    x_t = jnp.pad(x_t, ((0, 0), (0, n_pad - N)))
    tgt = targets.astype(jnp.int32).reshape(1, N)
    tgt = jnp.pad(tgt, ((0, 0), (0, n_pad - N)))

    kernel = functools.partial(_focal_loss_kernel, gamma=float(gamma),
                               n_total=N, block_cols=tn)

    partial = pl.pallas_call(
        kernel,
        out_shape=jax.ShapeDtypeStruct((nb * 8, 128), jnp.float32),
        grid=(nb,),
        in_specs=[
            pl.BlockSpec((C, tn), lambda i: (0, i)),   # logits (transposed)
            pl.BlockSpec((1, tn), lambda i: (0, i)),   # targets (lane-dense)
            pl.BlockSpec((C, 1), lambda i: (0, 0)),    # alpha (resident)
        ],
        out_specs=pl.BlockSpec((8, 128), lambda i: (i, 0)),
        compiler_params=pltpu.CompilerParams(
            dimension_semantics=("parallel",),
            vmem_limit_bytes=32 * 1024 * 1024),
    )(x_t, tgt, alpha)

    total = jnp.sum(partial[::8, 0])                                 # (nb,) partials
    return total / N if size_average else total


def _reference_focal_loss(logits, targets, alpha=None, gamma=2.0,
                          size_average=True):
    # Pure-JAX reference mirroring the PyTorch forward exactly.
    N, C = logits.shape
    if alpha is None:
        alpha = jnp.ones((C,), dtype=jnp.float32)
    alpha = jnp.asarray(alpha, jnp.float32).reshape(-1)
    P = jax.nn.softmax(logits.astype(jnp.float32), axis=1)
    class_mask = jax.nn.one_hot(targets, C, dtype=jnp.float32)
    probs = jnp.sum(P * class_mask, axis=1, keepdims=True)
    alpha_i = alpha[targets].reshape(-1, 1)
    log_p = jnp.log(probs)
    batch_loss = -alpha_i * jnp.power(1.0 - probs, gamma) * log_p
    return jnp.mean(batch_loss) if size_average else jnp.sum(batch_loss)


if __name__ == "__main__":
    key = jax.random.PRNGKey(0)
    k1, k2, k3 = jax.random.split(key, 3)

    N, C = 300, 16  # 300 samples, 16 classes (exercises multi-block + remainder)
    logits = jax.random.normal(k1, (N, C), dtype=jnp.float32)
    targets = jax.random.randint(k2, (N,), 0, C, dtype=jnp.int32)
    alpha = jax.random.uniform(k3, (C,), dtype=jnp.float32, minval=0.25, maxval=1.0)

    # Default alpha (ones), size_average=True. Force block_cols=128 so the
    # grid has 3 blocks and remainder masking (300 = 2*128 + 44) is exercised.
    loss = focal_loss(logits, targets, alpha=None, gamma=2.0,
                      size_average=True, block_cols=128)
    loss = jax.block_until_ready(loss)
    ref = _reference_focal_loss(logits, targets, alpha=None, gamma=2.0,
                                size_average=True)
    assert jnp.allclose(loss, ref, rtol=1e-5, atol=1e-5), (loss, ref)

    # Custom alpha, sum reduction, auto tile size.
    loss2 = focal_loss(logits, targets, alpha=alpha, gamma=2.0,
                       size_average=False)
    loss2 = jax.block_until_ready(loss2)
    ref2 = _reference_focal_loss(logits, targets, alpha=alpha, gamma=2.0,
                                 size_average=False)
    assert jnp.allclose(loss2, ref2, rtol=1e-5, atol=1e-5), (loss2, ref2)

    print("KERNEL_OK")
</pallas_src>

<mosaic_0001>
module attributes {stable_mosaic.version = 11 : i64} {
  func.func @_focal_loss_kernel(%arg0: i32, %arg1: memref<16x128xf32, #tpu.memory_space<vmem>>, %arg2: memref<1x128xi32, #tpu.memory_space<vmem>>, %arg3: memref<16x1xf32, #tpu.memory_space<vmem>>, %arg4: memref<8x128xf32, #tpu.memory_space<vmem>>) attributes {dimension_semantics = [#tpu.dimension_semantics<parallel>], iteration_bounds = array<i64: 3>, scalar_prefetch = 0 : i64, scratch_operands = 0 : i64, tpu.core_type = #tpu.core_type<tc>, window_params = [{transform_indices = @transform_0, window_bounds = array<i64: 16, 128>}, {transform_indices = @transform_1, window_bounds = array<i64: 1, 128>}, {pipeline_mode = #tpu.pipeline_mode<synchronous>, transform_indices = @transform_2, window_bounds = array<i64: 16, 1>}, {transform_indices = @transform_3, window_bounds = array<i64: 8, 128>}]} {
    %c0 = arith.constant 0 : index
    %c0_0 = arith.constant 0 : index
    %0 = vector.load %arg1[%c0, %c0_0] : memref<16x128xf32, #tpu.memory_space<vmem>>, vector<16x128xf32>
    %c0_1 = arith.constant 0 : index
    %c0_2 = arith.constant 0 : index
    %1 = vector.load %arg2[%c0_1, %c0_2] : memref<1x128xi32, #tpu.memory_space<vmem>>, vector<1x128xi32>
    %c0_3 = arith.constant 0 : index
    %c0_4 = arith.constant 0 : index
    %2 = vector.load %arg3[%c0_3, %c0_4] : memref<16x1xf32, #tpu.memory_space<vmem>>, vector<16x1xf32>
    %cst = arith.constant dense<0xFF800000> : vector<128xf32>
    %3 = vector.multi_reduction <maximumf>, %0, %cst [0] : vector<16x128xf32> to vector<128xf32>
    %4 = vector.shape_cast %3 : vector<128xf32> to vector<1x128xf32>
    %5 = vector.broadcast %4 : vector<1x128xf32> to vector<16x128xf32>
    %6 = arith.subf %0, %5 : vector<16x128xf32>
    %7 = math.exp %6 : vector<16x128xf32>
    %cst_5 = arith.constant dense<0.000000e+00> : vector<128xf32>
    %8 = vector.multi_reduction <add>, %7, %cst_5 [0] : vector<16x128xf32> to vector<128xf32>
    %9 = vector.shape_cast %8 : vector<128xf32> to vector<1x128xf32>
    %10 = math.log %9 : vector<1x128xf32>
    %11 = tpu.iota {dimensions = array<i32: 0>} : vector<16x128xi32>
    %12 = vector.broadcast %1 : vector<1x128xi32> to vector<16x128xi32>
    %13 = arith.cmpi eq, %11, %12 : vector<16x128xi32>
    %14 = arith.extui %13 : vector<16x128xi1> to vector<16x128xi32>
    %15 = arith.sitofp %14 : vector<16x128xi32> to vector<16x128xf32>
    %16 = arith.mulf %6, %15 : vector<16x128xf32>
    %cst_6 = arith.constant dense<0.000000e+00> : vector<128xf32>
    %17 = vector.multi_reduction <add>, %16, %cst_6 [0] : vector<16x128xf32> to vector<128xf32>
    %18 = vector.shape_cast %17 : vector<128xf32> to vector<1x128xf32>
    %19 = arith.subf %18, %10 : vector<1x128xf32>
    %20 = math.exp %19 : vector<1x128xf32>
    %21 = vector.broadcast %2 : vector<16x1xf32> to vector<16x128xf32>
    %22 = arith.mulf %21, %15 : vector<16x128xf32>
    %cst_7 = arith.constant dense<0.000000e+00> : vector<128xf32>
    %23 = vector.multi_reduction <add>, %22, %cst_7 [0] : vector<16x128xf32> to vector<128xf32>
    %24 = vector.shape_cast %23 : vector<128xf32> to vector<1x128xf32>
    %cst_8 = arith.constant 1.000000e+00 : f32
    %25 = vector.broadcast %cst_8 : f32 to vector<1x128xf32>
    %26 = arith.subf %25, %20 : vector<1x128xf32>
    %27 = arith.mulf %26, %26 : vector<1x128xf32>
    %cst_9 = arith.constant 0.000000e+00 : f32
    %28 = vector.broadcast %cst_9 : f32 to vector<1x128xf32>
    %29 = arith.subf %28, %24 : vector<1x128xf32>
    %30 = arith.mulf %29, %27 : vector<1x128xf32>
    %31 = arith.mulf %30, %19 : vector<1x128xf32>
    %32 = tpu.iota {dimensions = array<i32: 1>} : vector<1x128xi32>
    %c128_i32 = arith.constant 128 : i32
    %33 = arith.muli %arg0, %c128_i32 : i32
    %34 = vector.broadcast %33 : i32 to vector<1x128xi32>
    %35 = arith.addi %32, %34 : vector<1x128xi32>
    %c300_i32 = arith.constant 300 : i32
    %36 = vector.broadcast %c300_i32 : i32 to vector<1x128xi32>
    %37 = arith.cmpi slt, %35, %36 : vector<1x128xi32>
    %38 = arith.extui %37 : vector<1x128xi1> to vector<1x128xi32>
    %39 = arith.sitofp %38 : vector<1x128xi32> to vector<1x128xf32>
    %40 = arith.mulf %31, %39 : vector<1x128xf32>
    %41 = vector.shape_cast %40 : vector<1x128xf32> to vector<1x1x128xf32>
    %cst_10 = arith.constant dense<0.000000e+00> : vector<1xf32>
    %42 = vector.multi_reduction <add>, %41, %cst_10 [1, 2] : vector<1x1x128xf32> to vector<1xf32>
    %43 = vector.shape_cast %42 : vector<1xf32> to vector<1x1x1xf32>
    %44 = vector.extract %43[0, 0, 0] : f32 from vector<1x1x1xf32>
    %45 = vector.broadcast %44 : f32 to vector<8x128xf32>
    %c0_11 = arith.constant 0 : index
    %c0_12 = arith.constant 0 : index
    %46 = vector.load %arg4[%c0_11, %c0_12] : memref<8x128xf32, #tpu.memory_space<vmem>>, vector<8x128xf32>
    tpu.vector_store %arg4[%c0_11, %c0_12], %45 {strides = array<i32>} : memref<8x128xf32, #tpu.memory_space<vmem>>, vector<8x128xf32>,
    return
  }
  func.func @transform_0(%arg0: i32) -> (i32, i32) {
    %c0_i32 = arith.constant 0 : i32
    %c0_i32_0 = arith.constant 0 : i32
    return %c0_i32, %arg0 : i32, i32
  }
  func.func @transform_1(%arg0: i32) -> (i32, i32) {
    %c0_i32 = arith.constant 0 : i32
    %c0_i32_0 = arith.constant 0 : i32
    return %c0_i32, %arg0 : i32, i32
  }
  func.func @transform_2(%arg0: i32) -> (i32, i32) {
    %c0_i32 = arith.constant 0 : i32
    %c0_i32_0 = arith.constant 0 : i32
    %c0_i32_1 = arith.constant 0 : i32
    return %c0_i32, %c0_i32_0 : i32, i32
  }
  func.func @transform_3(%arg0: i32) -> (i32, i32) {
    %c0_i32 = arith.constant 0 : i32
    %c0_i32_0 = arith.constant 0 : i32
    return %arg0, %c0_i32 : i32, i32
  }
}

</mosaic_0001>

<bundles_post_ra>
// kernel: tpu_custom_call.1
= control target key start
LH: loop header
LB: loop body
LE: loop exit
PB: predicated region body
PF: predicated region fallthrough
CT: control target
= control target key end

     0   :  { %8 = vsyncpa [#allocation3], 0  ;;  %s773_s0 = inlined_call_operand.hbm [shape: f32[16,384], index: 0, kind: input, shape index: {}]   ;;  %s774_s1 = inlined_call_operand.vmem [shape: s32[1,384], index: 1, kind: input, shape index: {}]   ;;  %s775_s2 = inlined_call_operand.vmem [shape: f32[16,1], index: 2, kind: input, shape index: {}]   ;;  %s776_s3 = inlined_call_operand.hbm [shape: f32[24,128], index: 3, kind: output, shape index: {}]  }
   0x1   :  { %10 = vsyncpa [#allocation3 + $0x1], 0 }
   0x2   :  { %11 = vsyncpa [#allocation4], 0 }
   0x3   :  { %13 = vsyncpa [#allocation4 + $0x1], 0  ;;  %s597_s12 = smov 0   ;;  %s599_s13 = smov 0  }
   0x4   :  { %s601_s14 = smov 0   ;;  %s603_s15 = smov 0  }
   0x5 LB: > { %s618_s16 = sadd.s32 4294967295, %s568_s15   ;;  %s393_s17 = sadd.s32 4294967294, %s568_s15   ;;  %s568_s15 = sphi %s603_s15, %s789_s15   ;;  %s564_s14 = sphi %s601_s14, %s788_s14   ;;  %s560_s13 = sphi %s599_s13, %s787_s13   ;;  %s556_s12 = sphi %s597_s12, %s786_s12  }
   0x6   : > { %s622_s18 = sadd.s32 1, %s568_s15   ;;  %s26_s19 = sadd.s32 1, %s564_s14 }
   0x7   : > { %s23_s20 = ssub.s32 %s568_s15, %s622_s18  ;;  %p33_p0 = scmp.ne.s32.totalorder %s564_s14, %s560_s13 }
   0x8   : > { %p24_p1 = scmp.eq.s32.totalorder %s23_s20, 0  ;;  %p34_p2 = scmp.eq.s32.totalorder %s568_s15, 0 }
   0x9   : > { %p39_p3 = scmp.ne.s32.totalorder %s560_s13, %s556_s12  ;;  %p40_p4 = scmp.eq.s32.totalorder %s618_s16, 0 }
   0xa   : > { %s634_s21 = scalar_select %p24_p1, %s564_s14, %s26_s19  }
   0xb   : > { %p636_p5 = por %p34_p2, %p33_p0  ;;  %p640_p6 = por %p40_p4, %p39_p3 }
   0xc   : > { %p110_p7 = scmp.eq.s32.totalorder %s618_s16, 2  ;;  %p116_p8 = scmp.eq.s32.totalorder %s393_s17, 2 }
   0xd   : > { %p424_p9 = scmp.lt.s32.totalorder %s568_s15, 3  ;;  %s139_s26 = sand.u32 1, %s564_s14  }
   0xe   : > { %p646_p10 = por %p110_p7, %p33_p0  ;;  %p650_p11 = por %p116_p8, %p39_p3 }
   0xf   : > { %s397_s27 = sshll.u32 %s568_s15, 7  ;;  %s396_s28 = sshll.u32 %s139_s26, 4 }
  0x10   : > { %s780_s24 = scalar_select %p646_p10, 1, 0 }
  0x11   : > { %s781_s25 = scalar_select %p650_p11, 1, 0 }
  0x12   : > { %s659_s4 = scalar_lea.hbm %s773_s0, %s397_s27  ;;  %s143_s5 = scalar_lea.vmem [#allocation2], %s396_s28 }
  0x13   : > { %s149_s6 = sshll.u32 %s143_s5, 4  ;;  %p663_p12 = pnand %p424_p9, %p636_p5  ;;  %s667_s6 = int_to_ptr.vmem [resolvable:$true] %s149_s6 }
  0x14   : > { %s670_s8 = scalar_lea.sflag [#allocation3], %s139_s26  ;;  %s472_s9 = scalar_lea.hbm %s659_s4, 256 }
  0x15   : > { %p473_p0 = scmp.ne.s32.totalorder %s659_s4, %s472_s9  ;;  %p474_p1 = pneg %p663_p12 }
  0x16   : > { %s477_s17 = scalar_lea.hbm %s773_s0, 768  ;;  %p478_p4 = scmp.lt.u32.totalorder %s659_s4, %s773_s0 }
  0x17   : > { %p475_p2 = pnand %p474_p1, %p473_p0  ;;  %p479_p5 = scmp.lt.u32.totalorder %s477_s17, %s472_s9 }
  0x18   : > { %p481_p8 = scmp.lt.u32.totalorder %s472_s9, %s659_s4 }
  0x19   : > { %p476_p3 = pneg %p475_p2  ;;  %p480_p7 = por %p479_p5, %p478_p4 }
  0x1b   : > { %p482_p9 = por %p481_p8, %p480_p7 }
  0x1d   : > { %p483_p13 = pnand %p482_p9, %p476_p3 }
  0x1f   : > { %486 = shalt.err (!%p483_p13)
}
  0x20   : > { %s487_s22 = scalar_lea.vmem %s667_s6, 256  ;;  %s570_s26 = smov [#allocation2]  }
  0x21   : > { %p488_p0 = scmp.ne.s32.totalorder %s667_s6, %s487_s22  ;;  %s492_s27 = sshll.u32 %s570_s26, 4  ;;  %s493_s27 = int_to_ptr.vmem [resolvable:$false] %s492_s27 }
  0x22   : > { %s494_s28 = scalar_lea.vmem %s493_s27, 512  ;;  %p495_p10 = scmp.lt.s32.totalorder %s667_s6, %s493_s27 }
  0x23   : > { %p490_p2 = pnand %p488_p0, %p474_p1  ;;  %p496_p4 = scmp.lt.s32.totalorder %s494_s28, %s487_s22 }
  0x25   : > { %p491_p11 = pneg %p490_p2  ;;  %p497_p5 = por %p496_p4, %p495_p10 }
  0x27   : > { %p498_p7 = pnand %p497_p5, %p491_p11 }
  0x29   : > { %501 = shalt.err (!%p498_p7)
}
  0x2a   : > { %s571_s29 = smov 384   ;;  %s572_s30 = smov 128  }
  0x2b   : > { %s573_s5 = smov 8   ;;  %p163_p13 = scmp.lt.s32.totalorder %s568_s15, 4 }
  0x2c   : > { %419 = dma.hbm_to_vmem [thread:$0]  (!%p663_p12), %s659_s4, 256, %s667_s6, %s670_s8, %s571_s29, %s572_s30, %s573_s5  }
  0x2d   : > { %p783_p1 = scmp.ge.s32.totalorder %s568_s15, 1 }
  0x2f   : > { %p164_p3 = pnand %p783_p1, %p163_p13 }
  0x30   : > { %s702_s9 = sand.u32 (!%p164_p3), 1, %s560_s13  }
  0x31   : > { %167 = sbr.rel (%p164_p3) target bundleno = 435 (0x1b3), region = 32  ;;  %s399_s10 = sshll.u32 (!%p164_p3), %s702_s9, 4 }
  0x32   : > { %s170_s11 = scalar_lea.sflag (!%p164_p3), [#allocation3], %s702_s9  ;;  %s173_s17 = scalar_lea.vmem (!%p164_p3), [#allocation2], %s399_s10 }
  0x38   : > { %547 = dma.done.wait (%p640_p6), %s170_s11, 256  }
  0x39   : > { %549 = vsyncadd (%p640_p6), %s170_s11, 4294967040  ;;  %v574_v0 = vmov 0   ;;  %v205_v1 = vld [vmem:[%s775_s2] sm:$0xff]  ;;  %v206_v2 = vld [vmem:[%s775_s2 + $0x8] sm:$0xff]  ;;  %p199_p6 = scmp.lt.s32.totalorder %s618_s16, 2  ;;  %v229_v16 = vlaneseq  ;;  %v575_v25 = vmov 0.0  }
  0x3a   : > { %463 = vset.pattern.permute.xlu0 %v574_v0  ;;  %v202_v3 = vld [vmem:[%s173_s17] sm:$0xff]  ;;  %v203_v4 = vld [vmem:[%s173_s17 + $0x8] sm:$0xff]  ;;  %s404_s26 = sshll.u32 %s618_s16, 7  ;;  %vm287_vm3 = vcmask 1040384   ;;  %s400_s27 = sshll.u32 %s702_s9, 3 }
  0x3b   : > { %256 = vperm.xlu0 %463, %v205_v1   ;;  %v207_v5 = vmax.f32 %v202_v3, %v203_v4  ;;  %s200_s23 = scalar_select %p199_p6, %s618_s16, 2  ;;  %v230_v19 = vshrl.u32 %v229_v16, 7  ;;  %v279_v54 = vand.u32 127, %v229_v16  ;;  %v281_v55 = vstv %s404_s26 }
  0x3c   : > { %s198_s28 = scalar_lea.vmem [#allocation5], %s400_s27  ;;  %s732_s11 = scalar_lea.hbm %s776_s3, %s404_s26 }
  0x3d   : > { %v208_v6 = vrot.slane %v207_v5, 4  ;;  %s201_s22 = scalar_lea.vmem %s774_s1, %s200_s23  ;;  %v231_v21 = vadd.s32 8, %v230_v19  ;;  %v282_v59 = vadd.s32 %v281_v55, %v279_v54  ;;  %s314_s29 = sshll.u32 %s198_s28, 4  ;;  %s725_s29 = int_to_ptr.vmem [resolvable:$true] %s314_s29 }
  0x3e   : > { %v401_v22 = vld [vmem:[%s201_s22] ss:$0 sm:$0xff]  ;;  %s301_s17 = scalar_lea.sflag [#allocation4], %s702_s9  ;;  %s502_s4 = scalar_lea.vmem %s725_s29, 128 }
  0x3f   : > { %261 = vperm.xlu0 %463, %v206_v2   ;;  %v209_v7 = vmax.f32 %v207_v5, %v208_v6  ;;  %vm236_vm0 = vcmp.eq.s32.totalorder %v230_v19, %v401_v22  ;;  %vm237_vm1 = vcmp.eq.s32.totalorder %v231_v21, %v401_v22  ;;  %vm283_vm2 = vcmp.lt.s32.totalorder %v282_v59, 300  ;;  %p503_p10 = scmp.ne.s32.totalorder %s725_s29, %s502_s4  ;;  %p784_p11 = scmp.ne.s32.totalorder %s780_s24, 0 }
  0x40   : > { %v402_v26 = vsel %vm236_vm0, 1.0, %v575_v25  ;;  %v403_v27 = vsel %vm237_vm1, 1.0, %v575_v25  ;;  %v405_v0 = vsel %vm283_vm2, 1.0, %v575_v25  ;;  %s576_s6 = smov [#allocation5]  }
  0x41   : > { %v210_v8 = vrot.slane %v209_v7, 2  ;;  %p504_p12 = pnand %p503_p10, %p784_p11  ;;  %s506_s7 = sshll.u32 %s576_s6, 4  ;;  %s507_s7 = int_to_ptr.vmem [resolvable:$false] %s506_s7 }
  0x42   : > { %s508_s8 = scalar_lea.vmem %s507_s7, 256  ;;  %p509_p9 = scmp.lt.s32.totalorder %s725_s29, %s507_s7 }
  0x43   : > { %v211_v9 = vmax.f32 %v209_v7, %v210_v8  ;;  %p505_p8 = pneg %p504_p12  ;;  %p510_p0 = scmp.lt.s32.totalorder %s508_s8, %s502_s4 }
  0x45   : > { %v212_v10 = vrot.slane %v211_v9, 1  ;;  %p511_p2 = por %p510_p0, %p509_p9 }
  0x47   : > { %v213_v11 = vmax.f32 %v211_v9, %v212_v10  ;;  %p512_p4 = pnand %p511_p2, %p505_p8 }
  0x49   : > { %v214_v12 = vsub.f32 %v202_v3, %v213_v11  ;;  %v215_v13 = vsub.f32 %v203_v4, %v213_v11 }
  0x4b   : > { %v216_v14 = vmul.f32 1.442695, %v214_v12  ;;  %v218_v15 = vmul.f32 1.442695, %v215_v13  ;;  %v242_v29 = vmul.f32 %v402_v26, %v214_v12  ;;  %v243_v30 = vmul.f32 %v403_v27, %v215_v13 }
  0x4d   : > { %464 = vpow2.f32 %v216_v14  ;;  %v244_v32 = vadd.f32 %v243_v30, %v242_v29 }
  0x4e   : > { %466 = vpow2.f32 %v218_v15 }
  0x4f   : > { %v245_v34 = vrot.slane %v244_v32, 4 }
  0x51   : > { %v246_v36 = vadd.f32 %v245_v34, %v244_v32 }
  0x53   : > { %v247_v37 = vrot.slane %v246_v36, 2 }
  0x55   : > { %v248_v38 = vadd.f32 %v247_v37, %v246_v36 }
  0x57   : > { %v465_v17 = vpop.eup %464  ;;  %v249_v39 = vrot.slane %v248_v38, 1 }
  0x58   : > { %v467_v18 = vpop.eup %466 }
  0x59   : > { %v220_v20 = vadd.f32 %v467_v18, %v465_v17  ;;  %v250_v42 = vadd.f32 %v249_v39, %v248_v38 }
  0x5b   : > { %v221_v23 = vrot.slane %v220_v20, 4 }
  0x5d   : > { %v222_v24 = vadd.f32 %v221_v23, %v220_v20 }
  0x5f   : > { %v223_v28 = vrot.slane %v222_v24, 2 }
  0x61   : > { %v224_v31 = vadd.f32 %v223_v28, %v222_v24 }
  0x63   : > { %v225_v33 = vrot.slane %v224_v31, 1 }
  0x65   : > { %v226_v35 = vadd.f32 %v225_v33, %v224_v31 }
  0x67   : > { %468 = vlog2.f32 %v226_v35 }
  0x71   : > { %v469_v40 = vpop.eup %468 }
  0x72   : > { %v228_v41 = vmul.f32 0.6931472, %v469_v40 }
  0x74   : > { %v251_v43 = vsub.f32 %v250_v42, %v228_v41 }
  0x76   : > { %v252_v44 = vmul.f32 1.442695, %v251_v43 }
  0x78   : > { %470 = vpow2.f32 %v252_v44 }
  0x82   : > { %v471_v52 = vpop.eup %470 }
  0x83   : > { %v273_v57 = vsub.f32 1.0, %v471_v52 }
  0x85   : > { %v274_v61 = vmul.f32 %v273_v57, %v273_v57 }
  0xba   : > { %v257_v45 = vpop.permute.xlu0 %256 }
  0xbb   : > { %v264_v47 = vmul.f32 %v402_v26, %v257_v45 }
  0xbe   : > { %v262_v46 = vpop.permute.xlu0 %261 }
  0xbf   : > { %v265_v48 = vmul.f32 %v403_v27, %v262_v46 }
  0xc1   : > { %v266_v49 = vadd.f32 %v265_v48, %v264_v47 }
  0xc3   : > { %v267_v50 = vrot.slane %v266_v49, 4 }
  0xc5   : > { %v268_v51 = vadd.f32 %v267_v50, %v266_v49 }
  0xc7   : > { %v269_v53 = vrot.slane %v268_v51, 2 }
  0xc9   : > { %v270_v56 = vadd.f32 %v269_v53, %v268_v51 }
  0xcb   : > { %v271_v58 = vrot.slane %v270_v56, 1 }
  0xcd   : > { %v272_v60 = vadd.f32 %v271_v58, %v270_v56 }
  0xcf   : > { %v275_v62 = vsub.f32 0.0, %v272_v60 }
  0xd1   : > { %v276_v63 = vmul.f32 %v275_v62, %v274_v61 }
  0xd3   : > { %v277_v1 = vmul.f32 %v276_v63, %v251_v43 }
  0xd5   : > { %v286_v2 = vmul.f32 %v405_v0, %v277_v1 }
  0xd7   : > { %v288_v3 = vsel %vm287_vm3, %v286_v2, 0.0 }
  0xd8   : > { %289 = vadd.xlane.f32.xlu1 %v288_v3 }
 0x165   : > { %v290_v4 = vpop.xlane.xlu1 %289 }
 0x166   : > { %v291_v5 = vrot.slane %v290_v4, 4 }
 0x168   : > { %v292_v6 = vadd.f32 %v291_v5, %v290_v4 }
 0x16a   : > { %v293_v7 = vrot.slane %v292_v6, 2 }
 0x16c   : > { %v294_v8 = vadd.f32 %v293_v7, %v292_v6 }
 0x16e   : > { %v295_v9 = vrot.slane %v294_v8, 1 }
 0x170   : > { %v296_v10 = vadd.f32 %v295_v9, %v294_v8 }
 0x172   : > { %410 = vpush %v296_v10 }
 0x1a3   : > { %s411_s30 = spop %410 }
 0x1a4   : > { %v298_v11 = vstv %s411_s30 }
 0x1a5   : > { %299 = vst [vmem:[%s198_s28] sm:$0xff] %v298_v11 }
 0x1a6   : > { %515 = shalt.err (!%p512_p4)
}
 0x1a7   : > { %s516_s16 = scalar_lea.hbm %s732_s11, 128  ;;  %s520_s19 = scalar_lea.hbm %s776_s3, 384 }
 0x1a8   : > { %p517_p5 = scmp.ne.s32.totalorder %s732_s11, %s516_s16  ;;  %p521_p1 = scmp.lt.u32.totalorder %s732_s11, %s776_s3 }
 0x1a9   : > { %p522_p3 = scmp.lt.u32.totalorder %s520_s19, %s516_s16  ;;  %p524_p10 = scmp.lt.u32.totalorder %s516_s16, %s732_s11 }
 0x1aa   : > { %p518_p7 = pnand %p517_p5, %p784_p11 }
 0x1ab   : > { %p523_p6 = por %p522_p3, %p521_p1 }
 0x1ac   : > { %p519_p13 = pneg %p518_p7 }
 0x1ad   : > { %p525_p12 = por %p524_p10, %p523_p6 }
 0x1af   : > { %p526_p8 = pnand %p525_p12, %p519_p13 }
 0x1b1   : > { %529 = shalt.err (!%p526_p8)
}
 0x1b2   : > { %414 = dma.vmem_to_hbm [thread:$0]  (%p784_p11), %s725_s29, 128, %s732_s11, %s301_s17  }
 0x1b3 PF: > { %p425_p9 = scmp.ge.s32.totalorder %s568_s15, 2  ;;  %s326_s26 = sand.u32 1, %s556_s12  }
 0x1b4   : > { %p785_p0 = scmp.ne.s32.totalorder %s781_s25, 0  ;;  %s327_s27 = scalar_lea.sflag [#allocation4], %s326_s26 }
 0x1b6   : > { %p421_p2 = pnand %p425_p9, %p785_p0 }
 0x1b8   : > { %551 = dma.done.wait (!%p421_p2), %s327_s27, 128  }
 0x1b9   : > { %553 = vsyncadd (!%p421_p2), %s327_s27, 4294967168  ;;  %p16_p4 = scmp.ge.s32.totalorder %s622_s18, 5   ;;  %s786_s12 = smov %s560_s13 }
 0x1ba   : > { %s787_s13 = smov %s564_s14  ;;  %s788_s14 = smov %s634_s21 }
 0x1bb   : > { %s789_s15 = smov %s622_s18  ;;  %18 = sbr.rel (!%p16_p4) target bundleno = 5 (0x5), region = 80 }
 0x1c2   :  { %332 = vsyncpa [#allocation3], 1 }
 0x1c3   :  { %334 = vsyncpa [#allocation3 + $0x1], 1 }
 0x1c4   :  { %335 = vsyncpa [#allocation4], 1 }
 0x1c5   :  { %337 = vsyncpa [#allocation4 + $0x1], 1 }

</bundles_post_ra>
